<compile_context>
chip_gen: v6e
topology: v6e:2x2x1
jax: 0.10.0
libtpu: 0.0.40
codegen_flags: <defaults>
</compile_context>

<pallas_src>
import functools

import jax
import jax.numpy as jnp
from jax.experimental import pallas as pl
from jax.experimental.pallas import tpu as pltpu


def _round_up(x, m):
    return ((x + m - 1) // m) * m


# ----------------------------- Pallas kernel --------------------------------

def text_encoder_kernel(emb_ref, convw_ref, convb_ref,
                        attnw_ref, attnb_ref, attnq_ref,
                        out_ref, *, num_words, window_size):
    """One grid step == Bt batch elements.

    emb_ref   : (Bt, T_pad, E)   bf16 padded word embeddings
    convw_ref : (W*E, F_pad)     bf16 im2col conv weight (zero-padded filters)
    convb_ref : (1, F_pad)       f32
    attnw_ref : (F_pad, Q_pad)   f32
    attnb_ref : (1, Q_pad)       f32
    attnq_ref : (1, Q_pad)       f32
    out_ref   : (Bt, F_pad)      f32
    """
    Bt, T_pad, E = emb_ref.shape
    T = num_words
    W = window_size
    F_pad = convw_ref.shape[1]

    emb = emb_ref[...]                                            # (Bt, T_pad, E) bf16

    # --- im2col: concatenate the W static shifts along the lane axis ---------
    cols = jnp.concatenate([emb[:, w:w + T, :] for w in range(W)], axis=-1)
    cols = cols.reshape(Bt * T, W * E)                            # (Bt*T, W*E) bf16

    # --- Conv2d(1, F, (W, E), pad=((W-1)//2, 0)) as ONE MXU matmul -----------
    conv = jnp.dot(cols, convw_ref[...],
                   preferred_element_type=jnp.float32)            # (Bt*T, F_pad) f32
    conv = jnp.maximum(conv + convb_ref[...], 0.0)                # bias + ReLU

    # --- Additive attention: linear -> tanh -> query dot (VPU + lane reduce) -
    h = jnp.tanh(jnp.dot(conv, attnw_ref[...],
                         preferred_element_type=jnp.float32)
                 + attnb_ref[...])                                # (Bt*T, Q_pad) f32
    scores = jnp.sum(h * attnq_ref[...], axis=-1, keepdims=True)  # (Bt*T, 1)
    scores = scores.reshape(Bt, T, 1)

    # --- Softmax over the word axis (per example) ----------------------------
    m = jnp.max(scores, axis=1, keepdims=True)                    # (Bt, 1, 1)
    e = jnp.exp(scores - m)
    denom = jnp.sum(e, axis=1, keepdims=True)                     # (Bt, 1, 1)
    alpha = e * pl.reciprocal(denom, approx=True)                 # (Bt, T, 1)

    # --- Weighted sum over words (VPU multiply + sublane reduce) -------------
    conv3 = conv.reshape(Bt, T, F_pad)                            # (Bt, T, F_pad)
    out_ref[...] = jnp.sum(conv3 * alpha, axis=1)                 # (Bt, F_pad) f32


def text_encoder_pallas(emb_padded, conv_w_flat, conv_b, attn_w, attn_b, attn_q,
                        *, num_words, window_size, block_batch=8):
    """emb_padded: (B, T_pad, E) bf16 -> (B, F_pad) f32 (caller slices off F pad)."""
    B, T_pad, E = emb_padded.shape
    K, F_pad = conv_w_flat.shape
    Q_pad = attn_w.shape[1]

    Bt = block_batch
    B_pad = _round_up(B, Bt)
    if B_pad != B:
        emb_padded = jnp.pad(emb_padded, ((0, B_pad - B), (0, 0), (0, 0)))

    kernel = functools.partial(text_encoder_kernel,
                               num_words=num_words, window_size=window_size)

    out = pl.pallas_call(
        kernel,
        out_shape=jax.ShapeDtypeStruct((B_pad, F_pad), jnp.float32),
        grid_spec=pltpu.PrefetchScalarGridSpec(
            num_scalar_prefetch=0,
            grid=(B_pad // Bt,),
            in_specs=[
                pl.BlockSpec((Bt, T_pad, E), lambda b: (b, 0, 0)),  # per-block emb
                pl.BlockSpec((K, F_pad), lambda b: (0, 0)),          # conv weight
                pl.BlockSpec((1, F_pad), lambda b: (0, 0)),          # conv bias
                pl.BlockSpec((F_pad, Q_pad), lambda b: (0, 0)),      # attn linear W
                pl.BlockSpec((1, Q_pad), lambda b: (0, 0)),          # attn linear b
                pl.BlockSpec((1, Q_pad), lambda b: (0, 0)),          # attn query
            ],
            out_specs=pl.BlockSpec((Bt, F_pad), lambda b: (b, 0)),
        ),
        compiler_params=pltpu.CompilerParams(
            dimension_semantics=("parallel",)),
    )(emb_padded, conv_w_flat, conv_b, attn_w, attn_b, attn_q)
    return out[:B]


# ------------------------------ NewsEncoder ----------------------------------

class NewsEncoderPallas:
    """JAX/Pallas re-implementation of the PyTorch NewsEncoder forward pass."""

    def __init__(self, dataset_attributes, pretrained_word_embeddings,
                 word_embedding_dim, num_filters, window_size,
                 query_vector_dim, num_categories, key, block_batch=8):
        assert len(dataset_attributes) > 0
        assert window_size % 2 == 1, "odd window_size keeps the word length"
        self.window_size = window_size
        self.num_filters = num_filters
        self.block_batch = block_batch

        k = jax.random.split(key, 6)
        E, F, Q = word_embedding_dim, num_filters, query_vector_dim
        F_pad = _round_up(F, 128)
        Q_pad = _round_up(Q, 128)
        self._F, self._Q, self._E = F, Q, E
        self._F_pad, self._Q_pad = F_pad, Q_pad

        # Word embedding table kept in bf16 (halves the gathered activation bytes).
        self.word_embedding = jnp.asarray(pretrained_word_embeddings, jnp.bfloat16)

        # Conv2d(1, F, (W, E)) weight: torch (F, 1, W, E) -> im2col (W*E, F) -> pad F.
        torch_conv_w = jax.random.normal(k[0], (F, 1, window_size, E), jnp.float32) * 0.05
        conv_w = jnp.transpose(torch_conv_w[:, 0, :, :], (1, 2, 0))      # (W, E, F)
        conv_w = conv_w.reshape(window_size * E, F)                      # (W*E, F)
        self.conv_w_flat = jnp.pad(conv_w, ((0, 0), (0, F_pad - F))).astype(jnp.bfloat16)

        conv_b = jax.random.normal(k[1], (1, F), jnp.float32) * 0.05
        self.conv_b = jnp.pad(conv_b, ((0, 0), (0, F_pad - F)))          # (1, F_pad) f32

        attn_w = jax.random.normal(k[2], (F, Q), jnp.float32) * 0.05
        self.attn_w = jnp.pad(attn_w, ((0, F_pad - F), (0, Q_pad - Q)))  # (F_pad, Q_pad)
        attn_b = jax.random.normal(k[3], (1, Q), jnp.float32) * 0.05
        self.attn_b = jnp.pad(attn_b, ((0, 0), (0, Q_pad - Q)))          # (1, Q_pad)
        attn_q = jax.random.normal(k[4], (1, Q), jnp.float32) * 0.05
        self.attn_q = jnp.pad(attn_q, ((0, 0), (0, Q_pad - Q)))          # (1, Q_pad)

        # Category encoders (embedding_dim == num_filters, padding_idx=0 row zeroed).
        candidates = ["category", "subcategory"]
        self.category_names = [n for n in candidates if n in set(dataset_attributes)]
        self.category_tables = {}
        ck = jax.random.split(k[5], max(len(self.category_names), 1))
        for i, name in enumerate(self.category_names):
            tbl = jax.random.normal(ck[i], (num_categories, F), jnp.float32) * 0.05
            tbl = tbl.at[0].set(0.0)  # padding_idx=0
            self.category_tables[name] = tbl

    # --------------------------- Pallas forward -----------------------------

    def _gather_and_pad(self, title):
        """(B, T) int -> (B, T_pad, E) bf16, word axis zero-padded + 8-aligned."""
        emb = jnp.take(self.word_embedding, title, axis=0)               # (B, T, E) bf16
        T = title.shape[1]
        pad = (self.window_size - 1) // 2
        T_pad = _round_up(T + self.window_size - 1, 8)
        return jnp.pad(emb, ((0, 0), (pad, T_pad - T - pad), (0, 0)))

    def __call__(self, news):
        title = news["title"]                                            # (B, T) int32
        emb_padded = self._gather_and_pad(title)

        text_vec_padded = text_encoder_pallas(
            emb_padded, self.conv_w_flat, self.conv_b,
            self.attn_w, self.attn_b, self.attn_q,
            num_words=title.shape[1], window_size=self.window_size,
            block_batch=self.block_batch)
        text_vec = text_vec_padded[:, :self._F]                          # drop lane pad

        vectors = [text_vec]
        for name in self.category_names:
            vectors.append(jnp.take(self.category_tables[name], news[name], axis=0))
        if len(vectors) == 1:
            return vectors[0]
        return jnp.concatenate(vectors, axis=1)

    # ----------------- Pure-JAX reference of the same math ------------------

    def reference(self, news):
        title = news["title"]
        B, T = title.shape
        W, E, F, Q = self.window_size, self._E, self._F, self._Q
        pad = (W - 1) // 2

        emb = jnp.take(self.word_embedding, title, axis=0).astype(jnp.float32)
        emb_p = jnp.pad(emb, ((0, 0), (pad, pad), (0, 0)))               # (B, T+W-1, E)
        cols = jnp.concatenate([emb_p[:, w:w + T, :] for w in range(W)], axis=-1)

        conv_w = self.conv_w_flat.astype(jnp.float32)[:, :F]             # (W*E, F)
        conv = jnp.maximum(jnp.einsum("btk,kf->btf", cols, conv_w)
                           + self.conv_b[None, :, :F], 0.0)              # (B, T, F)
        h = jnp.tanh(jnp.einsum("btf,fq->btq", conv, self.attn_w[:F, :Q])
                     + self.attn_b[None, :, :Q])
        s = jnp.einsum("btq,q->bt", h, self.attn_q[0, :Q])               # (B, T)
        alpha = jax.nn.softmax(s, axis=1)
        text_vec = jnp.einsum("bt,btf->bf", alpha, conv)

        vectors = [text_vec]
        for name in self.category_names:
            vectors.append(jnp.take(self.category_tables[name], news[name], axis=0))
        return vectors[0] if len(vectors) == 1 else jnp.concatenate(vectors, axis=1)


# --------------------------------- main --------------------------------------

if __name__ == "__main__":
    key = jax.random.PRNGKey(0)
    k_emb, k_params, k_title, k_cat, k_sub = jax.random.split(key, 5)

    # Small shapes consistent with the module (grid of 2 batch-blocks of 8).
    batch_size = 16
    num_words_title = 16
    vocab_size = 50
    word_embedding_dim = 32
    num_filters = 32
    window_size = 3
    query_vector_dim = 16
    num_categories = 10
    dataset_attributes = ["title", "category", "subcategory"]

    pretrained = jax.random.normal(k_emb, (vocab_size, word_embedding_dim), jnp.float32) * 0.1

    encoder = NewsEncoderPallas(
        dataset_attributes=dataset_attributes,
        pretrained_word_embeddings=pretrained,
        word_embedding_dim=word_embedding_dim,
        num_filters=num_filters,
        window_size=window_size,
        query_vector_dim=query_vector_dim,
        num_categories=num_categories,
        key=k_params,
        block_batch=8,
    )

    news = {
        "title": jax.random.randint(k_title, (batch_size, num_words_title), 0, vocab_size, jnp.int32),
        "category": jax.random.randint(k_cat, (batch_size,), 0, num_categories, jnp.int32),
        "subcategory": jax.random.randint(k_sub, (batch_size,), 0, num_categories, jnp.int32),
    }

    out = encoder(news)
    out = jax.block_until_ready(out)

    expected_dim = num_filters * len(dataset_attributes)
    assert out.shape == (batch_size, expected_dim), out.shape

    ref = jax.block_until_ready(encoder.reference(news))
    max_err = float(jnp.max(jnp.abs(out - ref)))
    assert jnp.allclose(out, ref, rtol=1e-2, atol=2e-3), max_err

    print("KERNEL_OK")
</pallas_src>

<mosaic_0001>
module attributes {stable_mosaic.version = 11 : i64} {
  func.func @text_encoder_kernel(%arg0: i32, %arg1: memref<8x24x32xbf16, #tpu.memory_space<vmem>>, %arg2: memref<96x128xbf16, #tpu.memory_space<vmem>>, %arg3: memref<1x128xf32, #tpu.memory_space<vmem>>, %arg4: memref<128x128xf32, #tpu.memory_space<vmem>>, %arg5: memref<1x128xf32, #tpu.memory_space<vmem>>, %arg6: memref<1x128xf32, #tpu.memory_space<vmem>>, %arg7: memref<8x128xf32, #tpu.memory_space<vmem>>) attributes {dimension_semantics = [#tpu.dimension_semantics<parallel>], iteration_bounds = array<i64: 2>, scalar_prefetch = 0 : i64, scratch_operands = 0 : i64, tpu.core_type = #tpu.core_type<tc>, window_params = [{transform_indices = @transform_0, window_bounds = array<i64: 8, 24, 32>}, {pipeline_mode = #tpu.pipeline_mode<synchronous>, transform_indices = @transform_1, window_bounds = array<i64: 96, 128>}, {pipeline_mode = #tpu.pipeline_mode<synchronous>, transform_indices = @transform_2, window_bounds = array<i64: 1, 128>}, {pipeline_mode = #tpu.pipeline_mode<synchronous>, transform_indices = @transform_3, window_bounds = array<i64: 128, 128>}, {pipeline_mode = #tpu.pipeline_mode<synchronous>, transform_indices = @transform_4, window_bounds = array<i64: 1, 128>}, {pipeline_mode = #tpu.pipeline_mode<synchronous>, transform_indices = @transform_5, window_bounds = array<i64: 1, 128>}, {transform_indices = @transform_6, window_bounds = array<i64: 8, 128>}]} {
    %c0 = arith.constant 0 : index
    %c0_0 = arith.constant 0 : index
    %c0_1 = arith.constant 0 : index
    %0 = vector.load %arg1[%c0, %c0_0, %c0_1] : memref<8x24x32xbf16, #tpu.memory_space<vmem>>, vector<8x24x32xbf16>
    %1 = vector.extract_strided_slice %0 {offsets = [0, 0, 0], sizes = [8, 16, 32], strides = [1, 1, 1]} : vector<8x24x32xbf16> to vector<8x16x32xbf16>
    %2 = vector.extract_strided_slice %0 {offsets = [0, 1, 0], sizes = [8, 16, 32], strides = [1, 1, 1]} : vector<8x24x32xbf16> to vector<8x16x32xbf16>
    %3 = vector.extract_strided_slice %0 {offsets = [0, 2, 0], sizes = [8, 16, 32], strides = [1, 1, 1]} : vector<8x24x32xbf16> to vector<8x16x32xbf16>
    %4 = tpu.concatenate %1, %2, %3 in 2 : vector<8x16x32xbf16>, vector<8x16x32xbf16>, vector<8x16x32xbf16> -> vector<8x16x96xbf16>
    %5 = vector.shape_cast %4 : vector<8x16x96xbf16> to vector<128x96xbf16>
    %c0_2 = arith.constant 0 : index
    %c0_3 = arith.constant 0 : index
    %6 = vector.load %arg2[%c0_2, %c0_3] : memref<96x128xbf16, #tpu.memory_space<vmem>>, vector<96x128xbf16>
    %cst = arith.constant dense<0.000000e+00> : vector<128x128xf32>
    %7 = tpu.matmul %5, %6, %cst {dimension_numbers = #tpu.dot_dimension_numbers<[1], [0], [0], [1], [0, 0, 1, 1], [], []>} : vector<128x96xbf16>, vector<96x128xbf16>, vector<128x128xf32> -> vector<128x128xf32>
    %c0_4 = arith.constant 0 : index
    %c0_5 = arith.constant 0 : index
    %8 = vector.load %arg3[%c0_4, %c0_5] : memref<1x128xf32, #tpu.memory_space<vmem>>, vector<1x128xf32>
    %9 = vector.broadcast %8 : vector<1x128xf32> to vector<128x128xf32>
    %10 = arith.addf %7, %9 : vector<128x128xf32>
    %cst_6 = arith.constant 0.000000e+00 : f32
    %11 = vector.broadcast %cst_6 : f32 to vector<128x128xf32>
    %12 = arith.maximumf %10, %11 : vector<128x128xf32>
    %c0_7 = arith.constant 0 : index
    %c0_8 = arith.constant 0 : index
    %13 = vector.load %arg4[%c0_7, %c0_8] : memref<128x128xf32, #tpu.memory_space<vmem>>, vector<128x128xf32>
    %cst_9 = arith.constant dense<0.000000e+00> : vector<128x128xf32>
    %14 = tpu.matmul %12, %13, %cst_9 {dimension_numbers = #tpu.dot_dimension_numbers<[1], [0], [0], [1], [0, 0, 1, 1], [], []>} : vector<128x128xf32>, vector<128x128xf32>, vector<128x128xf32> -> vector<128x128xf32>
    %c0_10 = arith.constant 0 : index
    %c0_11 = arith.constant 0 : index
    %15 = vector.load %arg5[%c0_10, %c0_11] : memref<1x128xf32, #tpu.memory_space<vmem>>, vector<1x128xf32>
    %16 = vector.broadcast %15 : vector<1x128xf32> to vector<128x128xf32>
    %17 = arith.addf %14, %16 : vector<128x128xf32>
    %18 = math.tanh %17 : vector<128x128xf32>
    %c0_12 = arith.constant 0 : index
    %c0_13 = arith.constant 0 : index
    %19 = vector.load %arg6[%c0_12, %c0_13] : memref<1x128xf32, #tpu.memory_space<vmem>>, vector<1x128xf32>
    %20 = vector.broadcast %19 : vector<1x128xf32> to vector<128x128xf32>
    %21 = arith.mulf %18, %20 : vector<128x128xf32>
    %cst_14 = arith.constant dense<0.000000e+00> : vector<128xf32>
    %22 = vector.multi_reduction <add>, %21, %cst_14 [1] : vector<128x128xf32> to vector<128xf32>
    %23 = vector.shape_cast %22 : vector<128xf32> to vector<128x1xf32>
    %24 = vector.shape_cast %23 : vector<128x1xf32> to vector<8x16x1xf32>
    %cst_15 = arith.constant dense<0xFF800000> : vector<8x1xf32>
    %25 = vector.multi_reduction <maximumf>, %24, %cst_15 [1] : vector<8x16x1xf32> to vector<8x1xf32>
    %26 = vector.shape_cast %25 : vector<8x1xf32> to vector<8x1x1xf32>
    %27 = vector.broadcast %26 : vector<8x1x1xf32> to vector<8x16x1xf32>
    %28 = arith.subf %24, %27 : vector<8x16x1xf32>
    %29 = math.exp %28 : vector<8x16x1xf32>
    %cst_16 = arith.constant dense<0.000000e+00> : vector<8x1xf32>
    %30 = vector.multi_reduction <add>, %29, %cst_16 [1] : vector<8x16x1xf32> to vector<8x1xf32>
    %31 = vector.shape_cast %30 : vector<8x1xf32> to vector<8x1x1xf32>
    %32 = tpu.reciprocal %31 {approx = true} : vector<8x1x1xf32> -> vector<8x1x1xf32>
    %33 = vector.broadcast %32 : vector<8x1x1xf32> to vector<8x16x1xf32>
    %34 = arith.mulf %29, %33 : vector<8x16x1xf32>
    %35 = vector.shape_cast %12 : vector<128x128xf32> to vector<8x16x128xf32>
    %36 = vector.broadcast %34 : vector<8x16x1xf32> to vector<8x16x128xf32>
    %37 = arith.mulf %35, %36 : vector<8x16x128xf32>
    %cst_17 = arith.constant dense<0.000000e+00> : vector<8x128xf32>
    %38 = vector.multi_reduction <add>, %37, %cst_17 [1] : vector<8x16x128xf32> to vector<8x128xf32>
    %c0_18 = arith.constant 0 : index
    %c0_19 = arith.constant 0 : index
    %39 = vector.load %arg7[%c0_18, %c0_19] : memref<8x128xf32, #tpu.memory_space<vmem>>, vector<8x128xf32>
    tpu.vector_store %arg7[%c0_18, %c0_19], %38 {strides = array<i32>} : memref<8x128xf32, #tpu.memory_space<vmem>>, vector<8x128xf32>,
    return
  }
  func.func @transform_0(%arg0: i32) -> (i32, i32, i32) {
    %c0_i32 = arith.constant 0 : i32
    %c0_i32_0 = arith.constant 0 : i32
    %c0_i32_1 = arith.constant 0 : i32
    return %arg0, %c0_i32, %c0_i32_0 : i32, i32, i32
  }
  func.func @transform_1(%arg0: i32) -> (i32, i32) {
    %c0_i32 = arith.constant 0 : i32
    %c0_i32_0 = arith.constant 0 : i32
    %c0_i32_1 = arith.constant 0 : i32
    return %c0_i32, %c0_i32_0 : i32, i32
  }
  func.func @transform_2(%arg0: i32) -> (i32, i32) {
    %c0_i32 = arith.constant 0 : i32
    %c0_i32_0 = arith.constant 0 : i32
    %c0_i32_1 = arith.constant 0 : i32
    return %c0_i32, %c0_i32_0 : i32, i32
  }
  func.func @transform_3(%arg0: i32) -> (i32, i32) {
    %c0_i32 = arith.constant 0 : i32
    %c0_i32_0 = arith.constant 0 : i32
    %c0_i32_1 = arith.constant 0 : i32
    return %c0_i32, %c0_i32_0 : i32, i32
  }
  func.func @transform_4(%arg0: i32) -> (i32, i32) {
    %c0_i32 = arith.constant 0 : i32
    %c0_i32_0 = arith.constant 0 : i32
    %c0_i32_1 = arith.constant 0 : i32
    return %c0_i32, %c0_i32_0 : i32, i32
  }
  func.func @transform_5(%arg0: i32) -> (i32, i32) {
    %c0_i32 = arith.constant 0 : i32
    %c0_i32_0 = arith.constant 0 : i32
    %c0_i32_1 = arith.constant 0 : i32
    return %c0_i32, %c0_i32_0 : i32, i32
  }
  func.func @transform_6(%arg0: i32) -> (i32, i32) {
    %c0_i32 = arith.constant 0 : i32
    %c0_i32_0 = arith.constant 0 : i32
    return %arg0, %c0_i32 : i32, i32
  }
}

</mosaic_0001>

<bundles_post_ra>
// kernel: tpu_custom_call.1
= control target key start
LH: loop header
LB: loop body
LE: loop exit
PB: predicated region body
PF: predicated region fallthrough
CT: control target
= control target key end

     0   :  { %11 = vsyncpa [#allocation3], 0  ;;  %s2557_s0 = inlined_call_operand.hbm [shape: bf16[16,24,32], index: 0, kind: input, shape index: {}]   ;;  %s2558_s1 = inlined_call_operand.hbm [shape: bf16[96,128], index: 1, kind: input, shape index: {}]   ;;  %s2559_s2 = inlined_call_operand.vmem [shape: f32[1,128], index: 2, kind: input, shape index: {}]   ;;  %s2560_s3 = inlined_call_operand.hbm [shape: f32[128,128], index: 3, kind: input, shape index: {}]   ;;  %s2561_s4 = inlined_call_operand.vmem [shape: f32[1,128], index: 4, kind: input, shape index: {}]   ;;  %s2562_s5 = inlined_call_operand.vmem [shape: f32[1,128], index: 5, kind: input, shape index: {}]   ;;  %s2563_s6 = inlined_call_operand.hbm [shape: f32[16,128], index: 6, kind: output, shape index: {}]  }
   0x1   :  { %13 = vsyncpa [#allocation3 + $0x1], 0 }
   0x2   :  { %14 = vsyncpa [#allocation6], 0 }
   0x3   :  { %15 = vsyncpa [#allocation4], 0 }
   0x4   :  { %17 = vsyncpa [#allocation4 + $0x1], 0  ;;  %s1969_s21 = smov 0   ;;  %s1971_s22 = smov 0  }
   0x5   :  { %s1973_s23 = smov 0   ;;  %s1975_s24 = smov 0  }
   0x6 LB: > { %s1990_s25 = sadd.s32 4294967295, %s1922_s24   ;;  %s1385_s26 = sadd.s32 4294967294, %s1922_s24   ;;  %s1922_s24 = sphi %s1975_s24, %s2594_s24   ;;  %s1918_s23 = sphi %s1973_s23, %s2593_s23   ;;  %s1914_s22 = sphi %s1971_s22, %s2592_s22   ;;  %s1910_s21 = sphi %s1969_s21, %s2591_s21  }
   0x7   : > { %p43_p0 = scmp.ne.s32.totalorder %s1914_s22, %s1910_s21  ;;  %p2566_p1 = scmp.eq.s32.totalorder %s1990_s25, 0 }
   0x8   : > { %p172_p2 = scmp.eq.s32.totalorder %s1990_s25, 1  ;;  %p178_p3 = scmp.eq.s32.totalorder %s1385_s26, 1 }
   0x9   : > { %p1999_p4 = por %p2566_p1, %p43_p0  ;;  %p1386_p5 = scmp.ge.s32.totalorder %s1922_s24, 1 }
   0xa   : > { %p2004_p6 = por %p178_p3, %p43_p0  ;;  %p185_p7 = scmp.lt.s32.totalorder %s1922_s24, 3 }
   0xb   : > { %s2573_s27 = scalar_select %p1999_p4, 1, 0 }
   0xc   : > { %s2574_s28 = scalar_select %p2004_p6, 1, 0 }
   0xd   : > { %p2009_p8 = pnand %p1386_p5, %p185_p7  ;;  %s1924_s30 = smov [#allocation5]  }
   0xe   : > { %s197_s7 = sshll.u32 %s1924_s30, 4  ;;  %s1925_s9 = smov [#allocation7]   ;;  %s198_s7 = int_to_ptr.vmem [resolvable:$true] %s197_s7 }
   0xf   : > { %s2575_s29 = scalar_select %p2009_p8, 1, 0 }
  0x10   : > { %p1611_p9 = pneg %p2009_p8  ;;  %s213_s10 = sshll.u32 %s1925_s9, 4  ;;  %s214_s10 = int_to_ptr.vmem [resolvable:$true] %s213_s10 }
  0x11   : > { %s1785_s11 = scalar_lea.vmem %s198_s7, 768  ;;  %p1793_p5 = scmp.lt.s32.totalorder %s198_s7, %s198_s7 }
  0x12   : > { %p2018_p11 = pnand %p1611_p9, %p2566_p1  ;;  %p1786_p13 = scmp.ne.s32.totalorder %s198_s7, %s1785_s11 }
  0x13   : > { %p1794_p7 = scmp.lt.s32.totalorder %s1785_s11, %s1785_s11 }
  0x14   : > { %p1776_p12 = pneg %p2018_p11 }
  0x15   : > { %p1795_p10 = por %p1794_p7, %p1793_p5 }
  0x16   : > { %p1788_p0 = pnand %p1786_p13, %p1776_p12 }
  0x18   : > { %p1789_p3 = pneg %p1788_p0 }
  0x1a   : > { %p1796_p9 = pnand %p1795_p10, %p1789_p3 }
  0x1c   : > { %1799 = shalt.err (!%p1796_p9)
}
  0x1d   : > { %s2564_s12 = smov 64   ;;  %s2565_s13 = smov 4  }
  0x1e   : > { %1614 = dma.hbm_to_vmem [thread:$0]  (!%p2018_p11), %s2558_s1, 768, %s198_s7, [#allocation6], %s2564_s12, %s2564_s12, %s2565_s13  }
  0x1f   : > { %s1811_s16 = scalar_lea.vmem %s214_s10, 2048  ;;  %p1819_p10 = scmp.lt.s32.totalorder %s214_s10, %s214_s10 }
  0x20   : > { %p1812_p13 = scmp.ne.s32.totalorder %s214_s10, %s1811_s16  ;;  %p1820_p3 = scmp.lt.s32.totalorder %s1811_s16, %s1811_s16 }
  0x22   : > { %p1814_p0 = pnand %p1812_p13, %p1776_p12  ;;  %p1821_p7 = por %p1820_p3, %p1819_p10 }
  0x24   : > { %p1815_p5 = pneg %p1814_p0 }
  0x26   : > { %p1822_p9 = pnand %p1821_p7, %p1815_p5 }
  0x28   : > { %1825 = shalt.err (!%p1822_p9)
}
  0x29   : > { %s1928_s17 = smov 128   ;;  %s1929_s18 = smov 8  }
  0x2a   : > { %1617 = dma.hbm_to_vmem [thread:$0]  (!%p2018_p11), %s2560_s3, 2048, %s214_s10, [#allocation6], %s1928_s17, %s1928_s17, %s1929_s18  }
  0x2b   : > { %s2044_s26 = sadd.s32 1, %s1922_s24   ;;  %s30_s7 = sadd.s32 1, %s1918_s23 }
  0x2c   : > { %s27_s30 = ssub.s32 %s1922_s24, %s2044_s26  ;;  %p37_p13 = scmp.ne.s32.totalorder %s1918_s23, %s1914_s22 }
  0x2d   : > { %p28_p12 = scmp.eq.s32.totalorder %s27_s30, 0  ;;  %p38_p0 = scmp.eq.s32.totalorder %s1922_s24, 0 }
  0x2e   : > { %p2057_p10 = por %p172_p2, %p37_p13  ;;  %p1628_p3 = scmp.lt.s32.totalorder %s1922_s24, 2 }
  0x2f   : > { %s2053_s9 = scalar_select %p28_p12, %s1918_s23, %s30_s7  }
  0x30   : > { %p39_p5 = por %p38_p0, %p37_p13  ;;  %s233_s8 = sand.u32 1, %s1918_s23  }
  0x31   : > { %s2577_s11 = scalar_select %p2057_p10, 1, 0 }
  0x32   : > { %s1596_s14 = smul.u32 96, %s233_s8  ;;  %p2064_p11 = pnand %p1628_p3, %p39_p5 }
  0x33   : > { %s1597_s10 = smul.u32 1536, %s1922_s24  ;;  %s2075_s30 = scalar_lea.sflag [#allocation3], %s233_s8 }
  0x34   : > { %s237_s19 = scalar_lea.vmem [#allocation2], %s1596_s14  ;;  %p1828_p7 = pneg %p2064_p11 }
  0x35   : > { %s2071_s18 = scalar_lea.hbm %s2557_s0, %s1597_s10  ;;  %s245_s20 = sshll.u32 %s237_s19, 4  ;;  %s2073_s20 = int_to_ptr.vmem [resolvable:$true] %s245_s20 }
  0x36   : > { %s1826_s7 = scalar_lea.hbm %s2071_s18, 1536  ;;  %s1831_s10 = scalar_lea.hbm %s2557_s0, 3072 }
  0x37   : > { %p1827_p2 = scmp.ne.s32.totalorder %s2071_s18, %s1826_s7  ;;  %p1832_p13 = scmp.lt.s32.totalorder %s2071_s18, %s2557_s0 }
  0x38   : > { %p1833_p0 = scmp.lt.s32.totalorder %s1831_s10, %s1826_s7 }
  0x39   : > { %p1829_p9 = pnand %p1828_p7, %p1827_p2 }
  0x3a   : > { %p1834_p5 = por %p1833_p0, %p1832_p13 }
  0x3b   : > { %p1830_p12 = pneg %p1829_p9 }
  0x3d   : > { %p1835_p3 = pnand %p1834_p5, %p1830_p12 }
  0x3f   : > { %1838 = shalt.err (!%p1835_p3)
}
  0x40   : > { %s1839_s8 = scalar_lea.vmem %s2073_s20, 1536  ;;  %s1930_s14 = smov [#allocation2]  }
  0x41   : > { %p1840_p1 = scmp.ne.s32.totalorder %s2073_s20, %s1839_s8  ;;  %s1844_s19 = sshll.u32 %s1930_s14, 4  ;;  %s1845_s19 = int_to_ptr.vmem [resolvable:$false] %s1844_s19 }
  0x42   : > { %s1846_s12 = scalar_lea.vmem %s1845_s19, 3072  ;;  %p1847_p9 = scmp.lt.s32.totalorder %s2073_s20, %s1845_s19 }
  0x43   : > { %p1842_p6 = pnand %p1840_p1, %p1828_p7  ;;  %p1848_p10 = scmp.lt.s32.totalorder %s1846_s12, %s1839_s8 }
  0x45   : > { %p1843_p2 = pneg %p1842_p6  ;;  %p1849_p4 = por %p1848_p10, %p1847_p9 }
  0x47   : > { %p1850_p8 = pnand %p1849_p4, %p1843_p2 }
  0x49   : > { %1853 = shalt.err (!%p1850_p8)
}
  0x4a   : > { %s2579_s13 = smov 4   ;;  %s2580_s7 = smov 64  }
  0x4b   : > { %1621 = dma.hbm_to_vmem [thread:$0]  (!%p2064_p11), %s2071_s18, 1536, %s2073_s20, %s2075_s30, %s2580_s7, %s2580_s7, %s2579_s13  }
  0x4c   : > { %p2581_p1 = scmp.ne.s32.totalorder %s2575_s29, 0 }
  0x4d   : > { %s2102_s16 = sand.u32 (!%p2581_p1), 1, %s1914_s22   ;;  %p2582_p4 = scmp.ne.s32.totalorder (!%p2581_p1), %s2573_s27, 0 }
  0x4e   : > { %257 = sbr.rel (%p2581_p1) target bundleno = 893 (0x37d), region = 44  ;;  %s260_s17 = scalar_lea.sflag (!%p2581_p1), [#allocation3], %s2102_s16 }
  0x4f   : > { %s1598_s10 = smul.u32 (!%p2581_p1), 96, %s2102_s16 }
  0x51   : > { %s2106_s8 = scalar_lea.vmem (!%p2581_p1), [#allocation2], %s1598_s10 }
  0x53   : > { %1897 = dma.done.wait (%p2582_p4), %s260_s17, 1536  }
  0x54   : > { %1899 = vsyncadd (%p2582_p4), %s260_s17, 4294965760  ;;  %p2583_p6 = scmp.eq.s32.totalorder %s1990_s25, 0 }
  0x56   : > { %1901 = dma.done.wait (%p2583_p6), [#allocation6], 2816   ;;  %p2584_p8 = pmov %p2583_p6 }
  0x57   : > { %vm390_vm0 = vsmask.f32 7424  ;;  %v2117_v0 = vld [vmem:[%s2106_s8] sm:$0xff]   ;;  %v1673_v1 = vld [vmem:[%s2106_s8 + $0x8] ss:$0 sps:$4 sm:$0xff]   ;;  %vm503_vm1 = vcmask 1046528  }
  0x58   : > { %1903 = vsyncadd (%p2584_p8), [#allocation6], 4294964480  ;;  %v2121_v2 = vld [vmem:[%s2106_s8 + $0xc] sm:$0xff]   ;;  %v504_v3 = vrot.slane %v2117_v0, 1  ;;  %v505_v4 = vrot.slane %v1673_v1, 1  ;;  %v392_v5 = vshrl.u32 %v2117_v0, 16 }
  0x59   : > { %v394_v6 = vshll.u32 %v2117_v0, 16  ;;  %v1675_v7 = vld [vmem:[%s2106_s8 + $0x14] ss:$0 sps:$4 sm:$0xff]   ;;  %v399_v8 = vshll.u32 %v1673_v1, 16  ;;  %v507_v9 = vrot.slane %v2121_v2, 1  ;;  %v404_v10 = vshrl.u32 %v2121_v2, 16 }
  0x5a   : > { %v406_v11 = vshll.u32 %v2121_v2, 16  ;;  %v506_v12 = vsel %vm503_vm1, %v504_v3, %v505_v4  ;;  %v508_v14 = vrot.slane %v1675_v7, 1  ;;  %v411_v15 = vshll.u32 %v1675_v7, 16  ;;  %v2132_v16 = vld [vmem:[%s2106_s8 + $0x24] sm:$0xff]   ;;  %s1931_s27 = smov 64   ;;  %v2140_v27 = vld [vmem:[%s2106_s8 + $0x18] sm:$0xff]  }
  0x5b   : > { %v396_v13 = vrot.slane %v394_v6, 1  ;;  %528 = vrot.lane.b32.xlu1 %v506_v12, %s1931_s27  ;;  %v401_v17 = vrot.slane %v399_v8, 1  ;;  %v1677_v19 = vld [vmem:[%s2106_s8 + $0x2c] ss:$0 sps:$4 sm:$0xff]   ;;  %v428_v24 = vshrl.u32 %v2132_v16, 16  ;;  %v430_v25 = vshll.u32 %v2132_v16, 16 }
  0x5c   : > { %v408_v18 = vrot.slane %v406_v11, 1  ;;  %v509_v21 = vsel %vm503_vm1, %v507_v9, %v508_v14  ;;  %v413_v22 = vrot.slane %v411_v15, 1  ;;  %v435_v26 = vshll.u32 %v1677_v19, 16  ;;  %v1679_v29 = vld [vmem:[%s2106_s8 + $0x20] ss:$0 sps:$4 sm:$0xff]   ;;  %s1932_s29 = smov 32  }
  0x5d   : > { %v397_v20 = vor.u32 %v396_v13, %v392_v5  ;;  %v2145_v30 = vld [vmem:[%s2106_s8 + $0x3c] sm:$0xff]   ;;  %v432_v31 = vrot.slane %v430_v25, 1  ;;  %v513_v33 = vrot.slane %v2132_v16, 1  ;;  %v514_v34 = vrot.slane %v1677_v19, 1  ;;  %v2154_v39 = vld [vmem:[%s2106_s8 + $0x30] sm:$0xff]   ;;  %v1688_v56 = vld [vmem:[#allocation5 + $0x28] sm:$0xff]  }
  0x5e   : > { %v409_v23 = vor.u32 %v408_v18, %v404_v10  ;;  %v437_v32 = vrot.slane %v435_v26, 1  ;;  %v416_v36 = vshrl.u32 %v2140_v27, 16  ;;  %v418_v37 = vshll.u32 %v2140_v27, 16  ;;  %v1681_v42 = vld [vmem:[%s2106_s8 + $0x44] ss:$0 sps:$4 sm:$0xff]   ;;  %v2161_v47 = vld [vmem:[%s2106_s8 + $0x54] sm:$0xff]   ;;  %1480 = vmatprep.subr.bf16.mxu0 %v1688_v56 }
  0x5f   : > { %v402_v28 = vsel %vm390_vm0, %v397_v20, %v401_v17  ;;  %530 = vrot.lane.b32.xlu1 %v509_v21, %s1931_s27  ;;  %v423_v38 = vshll.u32 %v1679_v29, 16  ;;  %v433_v40 = vor.u32 %v432_v31, %v428_v24  ;;  %v510_v41 = vrot.slane %v2140_v27, 1  ;;  %v1683_v51 = vld [vmem:[%s2106_s8 + $0x38] ss:$0 sps:$4 sm:$0xff]   ;;  %v2171_v61 = vld [vmem:[%s2106_s8 + $0x48] sm:$0xff]   ;;  %v1689_v62 = vld [vmem:[#allocation5 + $0x20] sm:$0xff]   ;;  %1481 = vmatpush3.bf16.msra.mxu0 %v1688_v56 }
  0x60   : > { %487 = vrot.lane.b32.xlu0 %v402_v28, %s1932_s29  ;;  %v414_v35 = vsel %vm390_vm0, %v409_v23, %v413_v22  ;;  %v452_v43 = vshrl.u32 %v2145_v30, 16  ;;  %v454_v44 = vshll.u32 %v2145_v30, 16  ;;  %v420_v45 = vrot.slane %v418_v37, 1  ;;  %v1685_v5 = vld [vmem:[%s2106_s8 + $0x5c] ss:$0 sps:$4 sm:$0xff]   ;;  %1482 = vmatprep.subr.bf16.mxu0 %v1689_v62  ;;  %v1691_v24 = vld [vmem:[#allocation5 + $0x10] sm:$0xff]  }
  0x61   : > { %v425_v46 = vrot.slane %v423_v38, 1  ;;  %v438_v48 = vsel %vm390_vm0, %v433_v40, %v437_v32  ;;  %v459_v50 = vshll.u32 %v1681_v42, 16  ;;  %v511_v53 = vrot.slane %v1679_v29, 1  ;;  %v1690_v6 = vld [vmem:[#allocation5 + $0x18] sm:$0xff]   ;;  %v1687_v14 = vld [vmem:[%s2106_s8 + $0x50] ss:$0 sps:$4 sm:$0xff]  }
  0x62   : > { %v456_v49 = vrot.slane %v454_v44, 1  ;;  %v421_v52 = vor.u32 %v420_v45, %v416_v36  ;;  %v440_v54 = vshrl.u32 %v2154_v39, 16  ;;  %v442_v55 = vshll.u32 %v2154_v39, 16  ;;  %v2199_v38 = vld [vmem:[#allocation7 + $0x70] sm:$0xff]  ;;  %v776_v45 = vld [vmem:[#allocation7 + $0x68] sm:$0xff]  ;;  %v2227_v56 = vld [vmem:[#allocation7 + $0x20] sm:$0xff] }
  0x63   : > { %493 = vrot.lane.b32.xlu1 %v438_v48, %s1932_s29  ;;  %v515_v57 = vsel %vm503_vm1, %v513_v33, %v514_v34  ;;  %v461_v59 = vrot.slane %v459_v50, 1  ;;  %v447_v60 = vshll.u32 %v1683_v51, 16  ;;  %v519_v3 = vrot.slane %v2145_v30, 1  ;;  %1483 = vmatpush3.bf16.msra.mxu0 %v1689_v62  ;;  %v1692_v33 = vld [vmem:[#allocation5 + $0x8] sm:$0xff]   ;;  %v775_v48 = vld [vmem:[#allocation7 + $0x60] sm:$0xff]  ;;  %v773_v50 = vld [vmem:[#allocation7 + $0x50] sm:$0xff] }
  0x64   : > { %489 = vrot.lane.b32.xlu0 %v414_v35, %s1932_s29  ;;  %v457_v58 = vor.u32 %v456_v49, %v452_v43  ;;  %v426_v63 = vsel %vm390_vm0, %v421_v52, %v425_v46  ;;  %v444_v1 = vrot.slane %v442_v55, 1  ;;  %v520_v4 = vrot.slane %v1681_v42, 1  ;;  %1484 = vmatprep.subr.bf16.mxu0 %v1690_v6  ;;  %v2193_v34 = vld [vmem:[#allocation7 + $0x78] sm:$0xff]  ;;  %v1693_v43 = vld [vmem:[#allocation5] sm:$0xff]   ;;  %v2213_v52 = vld [vmem:[#allocation7 + $0x40] sm:$0xff]  ;;  %s1396_s12 = sshll.u32 %s2102_s16, 3 }
  0x65   : > { %v512_v7 = vsel %vm503_vm1, %v510_v41, %v511_v53  ;;  %v449_v9 = vrot.slane %v447_v60, 1  ;;  %v478_v10 = vshll.u32 %v2161_v47, 16  ;;  %v476_v12 = vshrl.u32 %v2161_v47, 16  ;;  %1564 = vmatprep.subr.mxu1 %v2193_v34  ;;  %v774_v49 = vld [vmem:[#allocation7 + $0x58] sm:$0xff]  ;;  %v2223_v55 = vld [vmem:[#allocation7 + $0x28] sm:$0xff]  ;;  %s1431_s13 = sshll.u32 %s1990_s25, 7 }
  0x66   : > { %v445_v8 = vor.u32 %v444_v1, %v440_v54  ;;  %v462_v11 = vsel %vm390_vm0, %v457_v58, %v461_v59  ;;  %v483_v13 = vshll.u32 %v1685_v5, 16  ;;  %v466_v15 = vshll.u32 %v2171_v61, 16  ;;  %1580 = vmatpush3.msra.mxu1 %v2193_v34  ;;  %v2215_v53 = vld [vmem:[#allocation7 + $0x38] sm:$0xff]  ;;  %v2219_v54 = vld [vmem:[#allocation7 + $0x30] sm:$0xff]  ;;  %s299_s7 = scalar_lea.vmem [#allocation8], %s1396_s12  ;;  %p2588_p11 = scmp.ne.s32.totalorder %s2577_s11, 0 }
  0x67   : > { %534 = vrot.lane.b32.xlu1 %v515_v57, %s1931_s27  ;;  %v480_v17 = vrot.slane %v478_v10, 1  ;;  %v516_v18 = vrot.slane %v2154_v39, 1  ;;  %v517_v19 = vrot.slane %v1683_v51, 1  ;;  %v464_v20 = vshrl.u32 %v2171_v61, 16  ;;  %1485 = vmatpush3.bf16.msra.mxu0 %v1690_v6  ;;  %v772_v51 = vld [vmem:[#allocation7 + $0x48] sm:$0xff]  ;;  %s1296_s10 = sshll.u32 %s299_s7, 4  ;;  %s1297_s10 = int_to_ptr.vmem [resolvable:$true] %s1296_s10 }
  0x68   : > { %491 = vrot.lane.b32.xlu0 %v426_v63, %s1932_s29  ;;  %v468_v21 = vrot.slane %v466_v15, 1  ;;  %v450_v22 = vsel %vm390_vm0, %v445_v8, %v449_v9  ;;  %v471_v23 = vshll.u32 %v1687_v14, 16  ;;  %v521_v25 = vsel %vm503_vm1, %v519_v3, %v520_v4  ;;  %1486 = vmatprep.subr.bf16.mxu0 %v1691_v24  ;;  %s1854_s15 = scalar_lea.vmem %s1297_s10, 128  ;;  %s1933_s25 = smov [#allocation8]  }
  0x69   : > { %v481_v26 = vor.u32 %v480_v17, %v476_v12  ;;  %v485_v28 = vrot.slane %v483_v13, 1  ;;  %v518_v29 = vsel %vm503_vm1, %v516_v18, %v517_v19  ;;  %v525_v36 = vrot.slane %v2161_v47, 1  ;;  %1565 = vmatprep.subr.mxu1 %v2199_v38  ;;  %p1855_p10 = scmp.ne.s32.totalorder %s1297_s10, %s1854_s15  ;;  %s1858_s18 = sshll.u32 %s1933_s25, 4  ;;  %s1859_s18 = int_to_ptr.vmem [resolvable:$false] %s1858_s18 }
  0x6a   : > { %v469_v31 = vor.u32 %v468_v21, %v464_v20  ;;  %v473_v32 = vrot.slane %v471_v23, 1  ;;  %v526_v37 = vrot.slane %v1685_v5, 1  ;;  %v522_v41 = vrot.slane %v2171_v61, 1  ;;  %1581 = vmatpush3.msra.mxu1 %v2199_v38  ;;  %v764_v23 = vld [vmem:[#allocation7 + $0x8] sm:$0xff]  ;;  %s1860_s20 = scalar_lea.vmem %s1859_s18, 256  ;;  %p1861_p13 = scmp.lt.s32.totalorder %s1297_s10, %s1859_s18 }
  0x6b   : > { %497 = vrot.lane.b32.xlu1 %v462_v11, %s1932_s29  ;;  %v486_v35 = vsel %vm390_vm0, %v481_v26, %v485_v28  ;;  %1487 = vmatpush3.bf16.msra.mxu0 %v1691_v24  ;;  %v523_v42 = vrot.slane %v1687_v14, 1  ;;  %vm544_vm2 = vcmask 261120   ;;  %vm561_vm3 = vcmask 523264   ;;  %v763_v24 = vld [vmem:[#allocation7] sm:$0xff]  ;;  %p1856_p7 = pnand %p1855_p10, %p2588_p11  ;;  %p1862_p0 = scmp.lt.s32.totalorder %s1860_s20, %s1854_s15 }
  0x6c   : > { %532 = vrot.lane.b32.xlu0 %v512_v7, %s1931_s27  ;;  %v474_v40 = vsel %vm390_vm0, %v469_v31, %v473_v32  ;;  %1488 = vmatprep.subr.bf16.mxu0 %v1692_v33  ;;  %v527_v44 = vsel %vm503_vm1, %v525_v36, %v526_v37  ;;  %vm633_vm4 = vcmask 785408   ;;  %vm1266_vm5 = vcmask 1041409  }
  0x6d   : > { %v524_v46 = vsel %vm503_vm1, %v522_v41, %v523_v42  ;;  %1566 = vmatprep.subr.mxu1 %v776_v45  ;;  %vm1268_vm6 = vcmask 1042434   ;;  %vm1270_vm7 = vcmask 1043459   ;;  %vm1272_vm8 = vcmask 1044484   ;;  %p1857_p12 = pneg %p1856_p7  ;;  %p1863_p5 = por %p1862_p0, %p1861_p13 }
  0x6e   : > { %1582 = vmatpush3.msra.mxu1 %v776_v45  ;;  %vm1274_vm9 = vcmask 1045509   ;;  %vm1276_vm10 = vcmask 1046534   ;;  %vm1278_vm11 = vcmask 1047559  }
  0x6f   : > { %538 = vrot.lane.b32.xlu1 %v521_v25, %s1931_s27  ;;  %1489 = vmatpush3.bf16.msra.mxu0 %v1692_v33  ;;  %v1413_v25 = vld [vmem:[%s2559_s2] ss:$0 sm:$0xff]  ;;  %p1864_p3 = pnand %p1863_p5, %p1857_p12 }
  0x70   : > { %495 = vrot.lane.b32.xlu0 %v450_v22, %s1932_s29  ;;  %1490 = vmatprep.subr.bf16.mxu0 %v1693_v43 }
  0x71   : > { %1567 = vmatprep.subr.mxu1 %v775_v48 }
  0x72   : > { %1583 = vmatpush3.msra.mxu1 %v775_v48 }
  0x73   : > { %501 = vrot.lane.b32.xlu1 %v486_v35, %s1932_s29  ;;  %1491 = vmatpush3.bf16.msra.mxu0 %v1693_v43 }
  0x74   : > { %536 = vrot.lane.b32.xlu0 %v518_v29, %s1931_s27  ;;  %1508 = vmatprep.subr.mxu0 %v2193_v34 }
  0x75   : > { %1568 = vmatprep.subr.mxu1 %v774_v49 }
  0x76   : > { %1584 = vmatpush3.msra.mxu1 %v774_v49 }
  0x77   : > { %542 = vrot.lane.b32.xlu1 %v527_v44, %s1931_s27  ;;  %1569 = vmatprep.subr.mxu1 %v773_v50 }
  0x78   : > { %499 = vrot.lane.b32.xlu0 %v474_v40, %s1932_s29  ;;  %1585 = vmatpush3.msra.mxu1 %v773_v50  ;;  %s1283_s29 = scalar_lea.sflag [#allocation4], %s2102_s16 }
  0x79   : > { %1570 = vmatprep.subr.mxu1 %v772_v51 }
  0x7a   : > { %1586 = vmatpush3.msra.mxu1 %v772_v51 }
  0x7b   : > { %1571 = vmatprep.subr.mxu1 %v2213_v52 }
  0x7c   : > { %540 = vrot.lane.b32.xlu0 %v524_v46, %s1931_s27  ;;  %1587 = vmatpush3.msra.mxu1 %v2213_v52  ;;  %s2520_s27 = scalar_lea.hbm %s2563_s6, %s1431_s13 }
  0x7d   : > { %1572 = vmatprep.subr.mxu1 %v2215_v53 }
  0x7e   : > { %1588 = vmatpush3.msra.mxu1 %v2215_v53 }
  0x7f   : > { %1573 = vmatprep.subr.mxu1 %v2219_v54 }
  0x80   : > { %1589 = vmatpush3.msra.mxu1 %v2219_v54 }
  0x81   : > { %1574 = vmatprep.subr.mxu1 %v2223_v55 }
  0x82   : > { %1590 = vmatpush3.msra.mxu1 %v2223_v55 }
  0x83   : > { %1575 = vmatprep.subr.mxu1 %v2227_v56 }
  0x84   : > { %1591 = vmatpush3.msra.mxu1 %v2227_v56 }
  0xcd   : > { %v529_v57 = vpop.permute.xlu1 %528 }
  0xd1   : > { %v531_v59 = vpop.permute.xlu1 %530 }
  0xd2   : > { %v488_v58 = vpop.permute.xlu0 %487 }
  0xd3   : > { %v546_v60 = vsel %vm544_vm2, %v2117_v0, %v488_v58 }
  0xd4   : > { %v563_v62 = vsel %vm561_vm3, %v546_v60, %v529_v57 }
  0xd5   : > { %1492 = vmatprep.mubr.msk.bf16.mxu0 %vm633_vm4, %v563_v62  ;;  %v494_v3 = vpop.permute.xlu1 %493 }
  0xd6   : > { %v490_v63 = vpop.permute.xlu0 %489  ;;  %v552_v0 = vsel %vm544_vm2, %v2132_v16, %v494_v3 }
  0xd7   : > { %v548_v1 = vsel %vm544_vm2, %v2121_v2, %v490_v63 }
  0xd8   : > { %v565_v4 = vsel %vm561_vm3, %v548_v1, %v531_v59 }
  0xd9   : > { %1493 = vmatmul.mubr.msk.bf16.vlgmr.msra.gmra.mxu0 %vm633_vm4, %v565_v4  ;;  %v535_v6 = vpop.permute.xlu1 %534 }
  0xda   : > { %v492_v5 = vpop.permute.xlu0 %491  ;;  %1509 = vmatpush3.msra.mxu0 %v2193_v34  ;;  %v569_v10 = vsel %vm561_vm3, %v552_v0, %v535_v6 }
  0xdb   : > { %1510 = vmatprep.subr.mxu0 %v2199_v38  ;;  %v550_v2 = vsel %vm544_vm2, %v2140_v27, %v492_v5 }
  0xdc   : > { %1511 = vmatpush3.msra.mxu0 %v2199_v38 }
  0xdd   : > { %1512 = vmatprep.subr.mxu0 %v776_v45  ;;  %v498_v9 = vpop.permute.xlu1 %497 }
  0xde   : > { %v533_v7 = vpop.permute.xlu0 %532  ;;  %1513 = vmatpush3.msra.mxu0 %v776_v45  ;;  %v556_v27 = vsel %vm544_vm2, %v2145_v30, %v498_v9 }
  0xdf   : > { %v567_v8 = vsel %vm561_vm3, %v550_v2, %v533_v7  ;;  %1514 = vmatprep.subr.mxu0 %v775_v48 }
  0xe0   : > { %1496 = vmatprep.mubr.msk.bf16.mxu0 %vm633_vm4, %v567_v8  ;;  %1515 = vmatpush3.msra.mxu0 %v775_v48 }
  0xe1   : > { %1497 = vmatmul.mubr.msk.bf16.gmra.mxu0 %vm633_vm4, %v569_v10  ;;  %1516 = vmatprep.subr.mxu0 %v774_v49  ;;  %v539_v16 = vpop.permute.xlu1 %538 }
  0xe2   : > { %v496_v11 = vpop.permute.xlu0 %495  ;;  %1517 = vmatpush3.msra.mxu0 %v774_v49  ;;  %v573_v17 = vsel %vm561_vm3, %v556_v27, %v539_v16 }
  0xe3   : > { %1518 = vmatprep.subr.mxu0 %v773_v50  ;;  %v554_v12 = vsel %vm544_vm2, %v2154_v39, %v496_v11 }
  0xe4   : > { %1519 = vmatpush3.msra.mxu0 %v773_v50 }
  0xe5   : > { %1520 = vmatprep.subr.mxu0 %v772_v51  ;;  %v502_v15 = vpop.permute.xlu1 %501 }
  0xe6   : > { %v537_v13 = vpop.permute.xlu0 %536  ;;  %1521 = vmatpush3.msra.mxu0 %v772_v51  ;;  %v560_v39 = vsel %vm544_vm2, %v2161_v47, %v502_v15  ;;  %v766_v47 = vld [vmem:[#allocation7 + $0x18] sm:$0xff] }
  0xe7   : > { %v571_v14 = vsel %vm561_vm3, %v554_v12, %v537_v13  ;;  %1522 = vmatprep.subr.mxu0 %v2213_v52  ;;  %1576 = vmatprep.subr.mxu1 %v766_v47  ;;  %v2364_v13 = vld [vmem:[%s2561_s4] ss:$0 sm:$0xff] }
  0xe8   : > { %1500 = vmatprep.mubr.msk.bf16.mxu0 %vm633_vm4, %v571_v14  ;;  %1523 = vmatpush3.msra.mxu0 %v2213_v52 }
  0xe9   : > { %1501 = vmatmul.mubr.msk.bf16.gmra.mxu0 %vm633_vm4, %v573_v17  ;;  %1524 = vmatprep.subr.mxu0 %v2215_v53  ;;  %v543_v18 = vpop.permute.xlu1 %542 }
  0xea   : > { %v500_v30 = vpop.permute.xlu0 %499  ;;  %1525 = vmatpush3.msra.mxu0 %v2215_v53  ;;  %v577_v22 = vsel %vm561_vm3, %v560_v39, %v543_v18  ;;  %1592 = vmatpush3.msra.mxu1 %v766_v47 }
  0xeb   : > { %1526 = vmatprep.subr.mxu0 %v2219_v54  ;;  %v558_v19 = vsel %vm544_vm2, %v2171_v61, %v500_v30  ;;  %v765_v61 = vld [vmem:[#allocation7 + $0x10] sm:$0xff] }
  0xec   : > { %1527 = vmatpush3.msra.mxu0 %v2219_v54  ;;  %1577 = vmatprep.subr.mxu1 %v765_v61 }
  0xed   : > { %1528 = vmatprep.subr.mxu0 %v2223_v55  ;;  %1593 = vmatpush3.msra.mxu1 %v765_v61 }
  0xee   : > { %v541_v20 = vpop.permute.xlu0 %540  ;;  %1529 = vmatpush3.msra.mxu0 %v2223_v55  ;;  %1578 = vmatprep.subr.mxu1 %v764_v23 }
  0xef   : > { %v575_v21 = vsel %vm561_vm3, %v558_v19, %v541_v20  ;;  %1530 = vmatprep.subr.mxu0 %v2227_v56  ;;  %1594 = vmatpush3.msra.mxu1 %v764_v23 }
  0xf0   : > { %1504 = vmatprep.mubr.msk.bf16.mxu0 %vm633_vm4, %v575_v21  ;;  %1531 = vmatpush3.msra.mxu0 %v2227_v56 }
  0xf1   : > { %1505 = vmatmul.mubr.msk.bf16.gmra.mxu0 %vm633_vm4, %v577_v22  ;;  %1532 = vmatprep.subr.mxu0 %v766_v47 }
  0xf2   : > { %1533 = vmatpush3.msra.mxu0 %v766_v47  ;;  %1579 = vmatprep.subr.mxu1 %v763_v24 }
  0xf3   : > { %1534 = vmatprep.subr.mxu0 %v765_v61  ;;  %1595 = vmatpush3.msra.mxu1 %v763_v24 }
  0xf4   : > { %1535 = vmatpush3.msra.mxu0 %v765_v61 }
  0xf5   : > { %1536 = vmatprep.subr.mxu0 %v764_v23 }
  0xf6   : > { %1537 = vmatpush3.msra.mxu0 %v764_v23 }
  0xf7   : > { %1538 = vmatprep.subr.mxu0 %v763_v24 }
  0xf8   : > { %1539 = vmatpush3.msra.mxu0 %v763_v24  ;;  %v2375_v24 = vld [vmem:[%s2562_s5] ss:$0 sm:$0xff] }
 0x199   : > { %v1494_v26 = vpop.f32.mrf.mxu0 }
 0x19a   : > { %v2281_v28 = vadd.f32 %v1494_v26, %v1413_v25 }
 0x19b   : > { %v684_v29 = vpop.f32.mrf.mxu0 }
 0x19c   : > { %v749_v31 = vmax.f32 %v2281_v28, 0.0  ;;  %v2284_v32 = vadd.f32 %v1413_v25, %v684_v29 }
 0x19d   : > { %v1495_v33 = vpop.f32.mrf.mxu0 }
 0x19e   : > { %v747_v34 = vmax.f32 %v2284_v32, 0.0  ;;  %v2287_v35 = vadd.f32 %v1495_v33, %v1413_v25  ;;  %1543 = vmatprep.mubr.f32.mxu1 %v749_v31 }
 0x19f   : > { %v687_v36 = vpop.f32.mrf.mxu0 }
 0x1a0   : > { %v750_v37 = vmax.f32 %v2287_v35, 0.0  ;;  %v2292_v38 = vadd.f32 %v1413_v25, %v687_v36  ;;  %1540 = vmatprep.mubr.f32.mxu0 %v747_v34 }
 0x1a1   : > { %v1498_v40 = vpop.f32.mrf.mxu0 }
 0x1a2   : > { %v748_v41 = vmax.f32 %v2292_v38, 0.0  ;;  %1544 = vmatmul.mubr.f32.vlgmr.msra.gmra.mxu1 %v750_v37  ;;  %v2304_v46 = vadd.f32 %v1498_v40, %v1413_v25 }
 0x1a3   : > { %v700_v42 = vpop.f32.mrf.mxu0 }
 0x1a4   : > { %v2299_v43 = vadd.f32 %v1413_v25, %v700_v42  ;;  %1541 = vmatmul.mubr.f32.vlgmr.msra.gmra.mxu0 %v748_v41  ;;  %v753_v53 = vmax.f32 %v2304_v46, 0.0 }
 0x1a5   : > { %v1499_v44 = vpop.f32.mrf.mxu0 }
 0x1a6   : > { %v751_v45 = vmax.f32 %v2299_v43, 0.0  ;;  %v2310_v51 = vadd.f32 %v1499_v44, %v1413_v25 }
 0x1a7   : > { %v703_v48 = vpop.f32.mrf.mxu0 }
 0x1a8   : > { %v2306_v49 = vadd.f32 %v1413_v25, %v703_v48  ;;  %1546 = vmatprep.mubr.f32.mxu1 %v751_v45  ;;  %v754_v57 = vmax.f32 %v2310_v51, 0.0 }
 0x1a9   : > { %v1502_v50 = vpop.f32.mrf.mxu0 }
 0x1aa   : > { %v752_v52 = vmax.f32 %v2306_v49, 0.0  ;;  %v2322_v59 = vadd.f32 %v1502_v50, %v1413_v25 }
 0x1ab   : > { %v716_v54 = vpop.f32.mrf.mxu0 }
 0x1ac   : > { %v2314_v55 = vadd.f32 %v1413_v25, %v716_v54  ;;  %1547 = vmatmul.mubr.f32.gmra.mxu1 %v752_v52  ;;  %v757_v4 = vmax.f32 %v2322_v59, 0.0 }
 0x1ad   : > { %v1503_v56 = vpop.f32.mrf.mxu0  ;;  %1549 = vmatprep.mubr.f32.mxu1 %v753_v53 }
 0x1ae   : > { %v755_v58 = vmax.f32 %v2314_v55, 0.0  ;;  %v2330_v1 = vadd.f32 %v1503_v56, %v1413_v25 }
 0x1af   : > { %v719_v60 = vpop.f32.mrf.mxu0 }
 0x1b0   : > { %v2324_v62 = vadd.f32 %v1413_v25, %v719_v60  ;;  %1550 = vmatmul.mubr.f32.gmra.mxu1 %v754_v57  ;;  %v758_v2 = vmax.f32 %v2330_v1, 0.0 }
 0x1b1   : > { %v1506_v63 = vpop.f32.mrf.mxu0  ;;  %1552 = vmatprep.mubr.f32.mxu1 %v755_v58 }
 0x1b2   : > { %v756_v3 = vmax.f32 %v2324_v62, 0.0  ;;  %v2342_v8 = vadd.f32 %v1506_v63, %v1413_v25 }
 0x1b3   : > { %v732_v5 = vpop.f32.mrf.mxu0 }
 0x1b4   : > { %v2334_v6 = vadd.f32 %v1413_v25, %v732_v5  ;;  %1553 = vmatmul.mubr.f32.gmra.mxu1 %v756_v3  ;;  %v2570_v27 = vmax.f32 %v2342_v8, 0.0 }
 0x1b5   : > { %v1507_v0 = vpop.f32.mrf.mxu0  ;;  %1555 = vmatprep.mubr.f32.mxu1 %v757_v4 }
 0x1b6   : > { %v2572_v7 = vmax.f32 %v2334_v6, 0.0  ;;  %v2350_v11 = vadd.f32 %v1507_v0, %v1413_v25 }
 0x1b7   : > { %v735_v9 = vpop.f32.mrf.mxu0 }
 0x1b8   : > { %v2344_v10 = vadd.f32 %v1413_v25, %v735_v9  ;;  %1556 = vmatmul.mubr.f32.gmra.mxu1 %v758_v2  ;;  %v2571_v12 = vmax.f32 %v2350_v11, 0.0 }
 0x1b9   : > { %1558 = vmatprep.mubr.f32.mxu1 %v2572_v7 }
 0x1ba   : > { %v760_v16 = vmax.f32 %v2344_v10, 0.0 }
 0x1bc   : > { %1559 = vmatmul.mubr.f32.gmra.mxu1 %v760_v16 }
 0x1bd   : > { %1561 = vmatprep.mubr.f32.mxu1 %v2570_v27 }
 0x1c0   : > { %1562 = vmatmul.mubr.f32.gmra.mxu1 %v2571_v12 }
 0x262   : > { %v1545_v14 = vpop.f32.mrf.mxu1 }
 0x263   : > { %v868_v15 = vadd.f32 %v1545_v14, %v2364_v13 }
 0x264   : > { %v1542_v17 = vpop.f32.mrf.mxu0  ;;  %v862_v30 = vpop.f32.mrf.mxu1 }
 0x265   : > { %1694 = vtanh.f32 %v868_v15  ;;  %v858_v39 = vadd.f32 %v1542_v17, %v2364_v13  ;;  %v863_v18 = vadd.f32 %v2364_v13, %v862_v30 }
 0x266   : > { %v852_v19 = vpop.f32.mrf.mxu0 }
 0x267   : > { %1696 = vtanh.f32 %v858_v39  ;;  %v853_v20 = vadd.f32 %v2364_v13, %v852_v19 }
 0x268   : > { %1698 = vtanh.f32 %v863_v18 }
 0x269   : > { %1700 = vtanh.f32 %v853_v20 }
 0x26c   : > { %v1548_v21 = vpop.f32.mrf.mxu1 }
 0x26d   : > { %v878_v22 = vadd.f32 %v1548_v21, %v2364_v13 }
 0x26e   : > { %v872_v47 = vpop.f32.mrf.mxu1 }
 0x26f   : > { %1702 = vtanh.f32 %v878_v22  ;;  %v873_v61 = vadd.f32 %v2364_v13, %v872_v47 }
 0x270   : > { %v1551_v23 = vpop.f32.mrf.mxu1 }
 0x271   : > { %1704 = vtanh.f32 %v873_v61  ;;  %v888_v25 = vadd.f32 %v1551_v23, %v2364_v13 }
 0x272   : > { %v1695_v26 = vpop.eup %1694  ;;  %v882_v29 = vpop.f32.mrf.mxu1 }
 0x273   : > { %1706 = vtanh.f32 %v888_v25  ;;  %v883_v33 = vadd.f32 %v2364_v13, %v882_v29  ;;  %v957_v36 = vmul.f32 %v1695_v26, %v2375_v24 }
 0x274   : > { %v1697_v40 = vpop.eup %1696  ;;  %v1554_v42 = vpop.f32.mrf.mxu1 }
 0x275   : > { %v1699_v44 = vpop.eup %1698  ;;  %1708 = vtanh.f32 %v883_v33  ;;  %v898_v48 = vadd.f32 %v1554_v42, %v2364_v13  ;;  %976 = vadd.xlane.f32.xlu0 %v957_v36  ;;  %v955_v50 = vmul.f32 %v1697_v40, %v2375_v24 }
 0x276   : > { %v892_v54 = vpop.f32.mrf.mxu1  ;;  %v956_v60 = vmul.f32 %v1699_v44, %v2375_v24  ;;  %v1701_v63 = vpop.eup %1700 }
 0x277   : > { %1710 = vtanh.f32 %v898_v48  ;;  %v893_v56 = vadd.f32 %v2364_v13, %v892_v54  ;;  %972 = vadd.xlane.f32.xlu1 %v955_v50  ;;  %v954_v15 = vmul.f32 %v1701_v63, %v2375_v24 }
 0x278   : > { %v1557_v5 = vpop.f32.mrf.mxu1 }
 0x279   : > { %1712 = vtanh.f32 %v893_v56  ;;  %v908_v0 = vadd.f32 %v1557_v5, %v2364_v13  ;;  %974 = vadd.xlane.f32.xlu0 %v956_v60 }
 0x27a   : > { %v902_v9 = vpop.f32.mrf.mxu1 }
 0x27b   : > { %1714 = vtanh.f32 %v908_v0  ;;  %v903_v14 = vadd.f32 %v2364_v13, %v902_v9 }
 0x27c   : > { %v1703_v17 = vpop.eup %1702  ;;  %v1560_v30 = vpop.f32.mrf.mxu1 }
 0x27d   : > { %1716 = vtanh.f32 %v903_v14  ;;  %v918_v39 = vadd.f32 %v1560_v30, %v2364_v13  ;;  %970 = vadd.xlane.f32.xlu0 %v954_v15  ;;  %v959_v22 = vmul.f32 %v1703_v17, %v2375_v24 }
 0x27e   : > { %v1705_v18 = vpop.eup %1704  ;;  %v912_v19 = vpop.f32.mrf.mxu1 }
 0x27f   : > { %1718 = vtanh.f32 %v918_v39  ;;  %v913_v20 = vadd.f32 %v2364_v13, %v912_v19  ;;  %v958_v21 = vmul.f32 %v1705_v18, %v2375_v24 }
 0x280   : > { %v1707_v47 = vpop.eup %1706  ;;  %v1563_v61 = vpop.f32.mrf.mxu1 }
 0x281   : > { %1720 = vtanh.f32 %v913_v20  ;;  %v928_v23 = vadd.f32 %v1563_v61, %v2364_v13  ;;  %978 = vadd.xlane.f32.xlu1 %v958_v21  ;;  %980 = vadd.xlane.f32.xlu0 %v959_v22  ;;  %v961_v36 = vmul.f32 %v1707_v47, %v2375_v24 }
 0x282   : > { %v1709_v25 = vpop.eup %1708  ;;  %v922_v26 = vpop.f32.mrf.mxu1 }
 0x283   : > { %1722 = vtanh.f32 %v928_v23  ;;  %v923_v29 = vadd.f32 %v2364_v13, %v922_v26  ;;  %v960_v33 = vmul.f32 %v1709_v25, %v2375_v24 }
 0x284   : > { %v1711_v40 = vpop.eup %1710 }
 0x285   : > { %1724 = vtanh.f32 %v923_v29  ;;  %982 = vadd.xlane.f32.xlu1 %v960_v33  ;;  %984 = vadd.xlane.f32.xlu0 %v961_v36  ;;  %v963_v48 = vmul.f32 %v1711_v40, %v2375_v24 }
 0x286   : > { %v1713_v42 = vpop.eup %1712 }
 0x287   : > { %v962_v44 = vmul.f32 %v1713_v42, %v2375_v24 }
 0x288   : > { %v1715_v50 = vpop.eup %1714 }
 0x289   : > { %986 = vadd.xlane.f32.xlu1 %v962_v44  ;;  %988 = vadd.xlane.f32.xlu0 %v963_v48  ;;  %v965_v13 = vmul.f32 %v1715_v50, %v2375_v24 }
 0x28a   : > { %v1717_v54 = vpop.eup %1716 }
 0x28b   : > { %v964_v56 = vmul.f32 %v1717_v54, %v2375_v24 }
 0x28c   : > { %v1719_v60 = vpop.eup %1718 }
 0x28d   : > { %990 = vadd.xlane.f32.xlu1 %v964_v56  ;;  %992 = vadd.xlane.f32.xlu0 %v965_v13  ;;  %v967_v5 = vmul.f32 %v1719_v60, %v2375_v24 }
 0x28e   : > { %v1721_v63 = vpop.eup %1720 }
 0x28f   : > { %v966_v0 = vmul.f32 %v1721_v63, %v2375_v24 }
 0x290   : > { %v1723_v9 = vpop.eup %1722 }
 0x291   : > { %996 = vadd.xlane.f32.xlu0 %v967_v5  ;;  %994 = vadd.xlane.f32.xlu1 %v966_v0  ;;  %v969_v15 = vmul.f32 %v1723_v9, %v2375_v24 }
 0x292   : > { %v1725_v14 = vpop.eup %1724 }
 0x293   : > { %v968_v17 = vmul.f32 %v1725_v14, %v2375_v24 }
 0x295   : > { %1000 = vadd.xlane.f32.xlu0 %v969_v15  ;;  %998 = vadd.xlane.f32.xlu1 %v968_v17 }
 0x2fe   : > { %v977_v30 = vpop.xlane.xlu0 %976 }
 0x300   : > { %v973_v20 = vpop.xlane.xlu1 %972 }
 0x302   : > { %v975_v39 = vpop.xlane.xlu0 %974 }
 0x303   : > { %v1009_v18 = vmax.f32 %v975_v39, %v977_v30 }
 0x305   : > { %v1010_v19 = vrot.slane %v1009_v18, 4 }
 0x306   : > { %v971_v21 = vpop.xlane.xlu0 %970 }
 0x307   : > { %v1011_v22 = vmax.f32 %v1009_v18, %v1010_v19  ;;  %v1002_v47 = vmax.f32 %v971_v21, %v973_v20 }
 0x309   : > { %v1012_v61 = vrot.slane %v1011_v22, 2  ;;  %v1003_v23 = vrot.slane %v1002_v47, 4 }
 0x30a   : > { %v979_v25 = vpop.xlane.xlu1 %978  ;;  %v981_v26 = vpop.xlane.xlu0 %980 }
 0x30b   : > { %v1013_v29 = vmax.f32 %v1011_v22, %v1012_v61  ;;  %v1004_v33 = vmax.f32 %v1002_v47, %v1003_v23  ;;  %v1016_v36 = vmax.f32 %v979_v25, %v981_v26 }
 0x30d   : > { %v1014_v40 = vrot.slane %v1013_v29, 1  ;;  %v1005_v42 = vrot.slane %v1004_v33, 2  ;;  %v1017_v24 = vrot.slane %v1016_v36, 4 }
 0x30e   : > { %v983_v44 = vpop.xlane.xlu1 %982  ;;  %v985_v48 = vpop.xlane.xlu0 %984 }
 0x30f   : > { %v1015_v50 = vmax.f32 %v1013_v29, %v1014_v40  ;;  %v1006_v54 = vmax.f32 %v1004_v33, %v1005_v42  ;;  %v1018_v56 = vmax.f32 %v1016_v36, %v1017_v24  ;;  %v1023_v13 = vmax.f32 %v983_v44, %v985_v48 }
 0x311   : > { %v1060_v60 = vsub.f32 %v975_v39, %v1015_v50  ;;  %v1061_v63 = vsub.f32 %v977_v30, %v1015_v50  ;;  %v1007_v5 = vrot.slane %v1006_v54, 1  ;;  %v1019_v0 = vrot.slane %v1018_v56, 2 }
 0x312   : > { %v1024_v9 = vrot.slane %v1023_v13, 4  ;;  %v2403_v14 = vpop.xlane.xlu1 %986  ;;  %v2405_v15 = vpop.xlane.xlu0 %988 }
 0x313   : > { %v1078_v17 = vmul.f32 1.442695, %v1060_v60  ;;  %v1080_v18 = vmul.f32 1.442695, %v1061_v63  ;;  %v1008_v19 = vmax.f32 %v1006_v54, %v1007_v5  ;;  %v1020_v22 = vmax.f32 %v1018_v56, %v1019_v0 }
 0x314   : > { %v1025_v47 = vmax.f32 %v1023_v13, %v1024_v9  ;;  %v1030_v61 = vmax.f32 %v2403_v14, %v2405_v15 }
 0x315   : > { %1726 = vpow2.f32 %v1078_v17  ;;  %v1058_v23 = vsub.f32 %v971_v21, %v1008_v19  ;;  %v1059_v29 = vsub.f32 %v973_v20, %v1008_v19  ;;  %v1021_v39 = vrot.slane %v1020_v22, 1 }
 0x316   : > { %1728 = vpow2.f32 %v1080_v18  ;;  %v1026_v30 = vrot.slane %v1025_v47, 2  ;;  %v1031_v33 = vrot.slane %v1030_v61, 4  ;;  %v991_v36 = vpop.xlane.xlu1 %990  ;;  %v993_v40 = vpop.xlane.xlu0 %992 }
 0x317   : > { %v1074_v42 = vmul.f32 1.442695, %v1058_v23  ;;  %v1076_v24 = vmul.f32 1.442695, %v1059_v29  ;;  %v1022_v50 = vmax.f32 %v1020_v22, %v1021_v39  ;;  %v1037_v60 = vmax.f32 %v991_v36, %v993_v40 }
 0x318   : > { %v1027_v63 = vmax.f32 %v1025_v47, %v1026_v30  ;;  %v1032_v54 = vmax.f32 %v1030_v61, %v1031_v33 }
 0x319   : > { %1730 = vpow2.f32 %v1074_v42  ;;  %v1062_v56 = vsub.f32 %v979_v25, %v1022_v50  ;;  %v1063_v13 = vsub.f32 %v981_v26, %v1022_v50  ;;  %v1038_v5 = vrot.slane %v1037_v60, 4 }
 0x31a   : > { %1732 = vpow2.f32 %v1076_v24  ;;  %v1028_v0 = vrot.slane %v1027_v63, 1  ;;  %v1033_v21 = vrot.slane %v1032_v54, 2  ;;  %v995_v20 = vpop.xlane.xlu1 %994  ;;  %v997_v9 = vpop.xlane.xlu0 %996 }
 0x31b   : > { %v1082_v17 = vmul.f32 1.442695, %v1062_v56  ;;  %v1084_v18 = vmul.f32 1.442695, %v1063_v13  ;;  %v1039_v19 = vmax.f32 %v1037_v60, %v1038_v5  ;;  %v1044_v27 = vmax.f32 %v995_v20, %v997_v9 }
 0x31c   : > { %v1029_v12 = vmax.f32 %v1027_v63, %v1028_v0  ;;  %v1034_v23 = vmax.f32 %v1032_v54, %v1033_v21 }
 0x31d   : > { %1734 = vpow2.f32 %v1082_v17  ;;  %v1040_v22 = vrot.slane %v1039_v19, 2  ;;  %v1045_v29 = vrot.slane %v1044_v27, 4 }
 0x31e   : > { %1736 = vpow2.f32 %v1084_v18  ;;  %v1064_v47 = vsub.f32 %v983_v44, %v1029_v12  ;;  %v1065_v61 = vsub.f32 %v985_v48, %v1029_v12  ;;  %v1035_v25 = vrot.slane %v1034_v23, 1  ;;  %v2409_v26 = vpop.xlane.xlu1 %998  ;;  %v2411_v39 = vpop.xlane.xlu0 %1000 }
 0x31f   : > { %v1041_v30 = vmax.f32 %v1039_v19, %v1040_v22  ;;  %v1046_v33 = vmax.f32 %v1044_v27, %v1045_v29  ;;  %v1051_v42 = vmax.f32 %v2409_v26, %v2411_v39 }
 0x320   : > { %v1086_v24 = vmul.f32 1.442695, %v1064_v47  ;;  %v1088_v50 = vmul.f32 1.442695, %v1065_v61  ;;  %v1036_v60 = vmax.f32 %v1034_v23, %v1035_v25 }
 0x321   : > { %v1042_v63 = vrot.slane %v1041_v30, 1  ;;  %v1047_v54 = vrot.slane %v1046_v33, 2  ;;  %v1052_v56 = vrot.slane %v1051_v42, 4 }
 0x322   : > { %v2415_v13 = vpop.eup %1726  ;;  %1738 = vpow2.f32 %v1086_v24  ;;  %v1066_v12 = vsub.f32 %v2403_v14, %v1036_v60  ;;  %v1067_v44 = vsub.f32 %v2405_v15, %v1036_v60 }
 0x323   : > { %v2419_v48 = vpop.eup %1728  ;;  %1740 = vpow2.f32 %v1088_v50  ;;  %v1043_v27 = vmax.f32 %v1041_v30, %v1042_v63  ;;  %v1048_v5 = vmax.f32 %v1046_v33, %v1047_v54  ;;  %v1053_v0 = vmax.f32 %v1051_v42, %v1052_v56 }
 0x324   : > { %v1113_v21 = vadd.f32 %v2419_v48, %v2415_v13  ;;  %v1090_v17 = vmul.f32 1.442695, %v1066_v12  ;;  %v1092_v18 = vmul.f32 1.442695, %v1067_v44 }
 0x325   : > { %v1068_v19 = vsub.f32 %v991_v36, %v1043_v27  ;;  %v1069_v23 = vsub.f32 %v993_v40, %v1043_v27  ;;  %v1049_v22 = vrot.slane %v1048_v5, 1  ;;  %v1054_v29 = vrot.slane %v1053_v0, 2 }
 0x326   : > { %v2423_v47 = vpop.eup %1730  ;;  %v1114_v14 = vrot.slane %v1113_v21, 4  ;;  %1742 = vpow2.f32 %v1090_v17 }
 0x327   : > { %v2425_v15 = vpop.eup %1732  ;;  %1744 = vpow2.f32 %v1092_v18  ;;  %v1094_v61 = vmul.f32 1.442695, %v1068_v19  ;;  %v1096_v25 = vmul.f32 1.442695, %v1069_v23  ;;  %v1050_v30 = vmax.f32 %v1048_v5, %v1049_v22 }
 0x328   : > { %v1115_v33 = vadd.f32 %v1114_v14, %v1113_v21  ;;  %v1106_v42 = vadd.f32 %v2425_v15, %v2423_v47  ;;  %v1055_v24 = vmax.f32 %v1053_v0, %v1054_v29 }
 0x329   : > { %1746 = vpow2.f32 %v1094_v61  ;;  %v1070_v36 = vsub.f32 %v995_v20, %v1050_v30  ;;  %v1071_v40 = vsub.f32 %v997_v9, %v1050_v30 }
 0x32a   : > { %v2429_v50 = vpop.eup %1734  ;;  %v1116_v60 = vrot.slane %v1115_v33, 2  ;;  %v1107_v63 = vrot.slane %v1106_v42, 4  ;;  %1748 = vpow2.f32 %v1096_v25  ;;  %v1056_v54 = vrot.slane %v1055_v24, 1 }
 0x32b   : > { %v2431_v56 = vpop.eup %1736  ;;  %v1098_v12 = vmul.f32 1.442695, %v1070_v36  ;;  %v1100_v44 = vmul.f32 1.442695, %v1071_v40 }
 0x32c   : > { %v1117_v27 = vadd.f32 %v1116_v60, %v1115_v33  ;;  %v1108_v5 = vadd.f32 %v1107_v63, %v1106_v42  ;;  %v1120_v21 = vadd.f32 %v2431_v56, %v2429_v50  ;;  %v1057_v17 = vmax.f32 %v1055_v24, %v1056_v54 }
 0x32d   : > { %1750 = vpow2.f32 %v1098_v12 }
 0x32e   : > { %v1109_v0 = vrot.slane %v1108_v5, 2  ;;  %v1121_v20 = vrot.slane %v1120_v21, 4  ;;  %1752 = vpow2.f32 %v1100_v44  ;;  %v1072_v18 = vsub.f32 %v2409_v26, %v1057_v17 }
 0x32f   : > { %v2435_v9 = vpop.eup %1738  ;;  %v1073_v19 = vsub.f32 %v2411_v39, %v1057_v17  ;;  %v1118_v22 = vrot.slane %v1117_v27, 1 }
 0x330   : > { %v2439_v23 = vpop.eup %1740  ;;  %v1110_v29 = vadd.f32 %v1109_v0, %v1108_v5  ;;  %v1122_v14 = vadd.f32 %v1121_v20, %v1120_v21  ;;  %v1102_v25 = vmul.f32 1.442695, %v1072_v18 }
 0x331   : > { %v1127_v61 = vadd.f32 %v2439_v23, %v2435_v9  ;;  %v1104_v30 = vmul.f32 1.442695, %v1073_v19  ;;  %v1119_v26 = vadd.f32 %v1118_v22, %v1117_v27 }
 0x332   : > { %v1111_v33 = vrot.slane %v1110_v29, 1  ;;  %v1123_v42 = vrot.slane %v1122_v14, 2  ;;  %1754 = vpow2.f32 %v1102_v25 }
 0x333   : > { %v2443_v24 = vpop.eup %1742  ;;  %v1128_v36 = vrot.slane %v1127_v61, 4  ;;  %1756 = vpow2.f32 %v1104_v30 }
 0x334   : > { %v2445_v40 = vpop.eup %1744  ;;  %v1112_v39 = vadd.f32 %v1111_v33, %v1110_v29  ;;  %v1124_v60 = vadd.f32 %v1123_v42, %v1122_v14 }
 0x335   : > { %v1129_v63 = vadd.f32 %v1128_v36, %v1127_v61  ;;  %v1134_v54 = vadd.f32 %v2445_v40, %v2443_v24 }
 0x336   : > { %v2449_v12 = vpop.eup %1746  ;;  %1758 = vrcp.f32 %v1112_v39  ;;  %v1125_v44 = vrot.slane %v1124_v60, 1 }
 0x337   : > { %v2451_v5 = vpop.eup %1748  ;;  %v1130_v21 = vrot.slane %v1129_v63, 2  ;;  %v1135_v17 = vrot.slane %v1134_v54, 4  ;;  %1760 = vrcp.f32 %v1119_v26 }
 0x338   : > { %v1126_v0 = vadd.f32 %v1125_v44, %v1124_v60  ;;  %v1141_v27 = vadd.f32 %v2451_v5, %v2449_v12 }
 0x339   : > { %v1131_v20 = vadd.f32 %v1130_v21, %v1129_v63  ;;  %v1136_v18 = vadd.f32 %v1135_v17, %v1134_v54 }
 0x33a   : > { %v2455_v19 = vpop.eup %1750  ;;  %1762 = vrcp.f32 %v1126_v0  ;;  %v1142_v22 = vrot.slane %v1141_v27, 4 }
 0x33b   : > { %v2457_v29 = vpop.eup %1752  ;;  %v1132_v14 = vrot.slane %v1131_v20, 1  ;;  %v1137_v61 = vrot.slane %v1136_v18, 2 }
 0x33c   : > { %v1143_v25 = vadd.f32 %v1142_v22, %v1141_v27  ;;  %v1148_v30 = vadd.f32 %v2457_v29, %v2455_v19 }
 0x33d   : > { %v1133_v33 = vadd.f32 %v1132_v14, %v1131_v20  ;;  %v1138_v42 = vadd.f32 %v1137_v61, %v1136_v18 }
 0x33e   : > { %v1144_v36 = vrot.slane %v1143_v25, 2  ;;  %v1149_v26 = vrot.slane %v1148_v30, 4 }
 0x33f   : > { %1764 = vrcp.f32 %v1133_v33  ;;  %v1139_v39 = vrot.slane %v1138_v42, 1  ;;  %v2461_v60 = vpop.eup %1754 }
 0x340   : > { %v1145_v63 = vadd.f32 %v1144_v36, %v1143_v25  ;;  %v1150_v54 = vadd.f32 %v1149_v26, %v1148_v30  ;;  %v2463_v44 = vpop.eup %1756 }
 0x341   : > { %v1140_v21 = vadd.f32 %v1139_v39, %v1138_v42  ;;  %v1155_v27 = vadd.f32 %v2463_v44, %v2461_v60 }
 0x342   : > { %v1146_v17 = vrot.slane %v1145_v63, 1  ;;  %v1151_v0 = vrot.slane %v1150_v54, 2 }
 0x343   : > { %v1759_v7 = vpop.eup %1758  ;;  %1766 = vrcp.f32 %v1140_v21  ;;  %v1156_v14 = vrot.slane %v1155_v27, 4 }
 0x344   : > { %v1147_v20 = vadd.f32 %v1146_v17, %v1145_v63  ;;  %v1761_v18 = vpop.eup %1760  ;;  %v1152_v22 = vadd.f32 %v1151_v0, %v1150_v54  ;;  %v1170_v61 = vmul.f32 %v1759_v7, %v2423_v47  ;;  %v1171_v33 = vmul.f32 %v1759_v7, %v2425_v15 }
 0x345   : > { %v1157_v36 = vadd.f32 %v1156_v14, %v1155_v27  ;;  %v1172_v42 = vmul.f32 %v1761_v18, %v2415_v13  ;;  %v1173_v26 = vmul.f32 %v1761_v18, %v2419_v48 }
 0x346   : > { %1768 = vrcp.f32 %v1147_v20  ;;  %v1153_v30 = vrot.slane %v1152_v22, 1  ;;  %v1186_v54 = vmul.f32 %v1170_v61, %v747_v34  ;;  %v1187_v7 = vmul.f32 %v1171_v33, %v748_v41 }
 0x347   : > { %v1763_v25 = vpop.eup %1762  ;;  %v1158_v17 = vrot.slane %v1157_v36, 2  ;;  %v1188_v13 = vmul.f32 %v1172_v42, %v749_v31  ;;  %v1189_v48 = vmul.f32 %v1173_v26, %v750_v37 }
 0x348   : > { %v1174_v39 = vmul.f32 %v1763_v25, %v2429_v50  ;;  %v1175_v21 = vmul.f32 %v1763_v25, %v2431_v56  ;;  %v1154_v63 = vadd.f32 %v1153_v30, %v1152_v22  ;;  %v1202_v41 = vadd.f32 %v1187_v7, %v1186_v54 }
 0x349   : > { %v1159_v47 = vadd.f32 %v1158_v17, %v1157_v36  ;;  %v1209_v37 = vadd.f32 %v1189_v48, %v1188_v13  ;;  %v2587_v13 = vmax.f32 %v2342_v8, 0.0 }
 0x34a   : > { %1770 = vrcp.f32 %v1154_v63  ;;  %v1190_v50 = vmul.f32 %v1174_v39, %v751_v45  ;;  %v1191_v56 = vmul.f32 %v1175_v21, %v752_v52 }
 0x34b   : > { %v1160_v38 = vrot.slane %v1159_v47, 1  ;;  %v1210_v51 = vrot.slane %v1209_v37, 4 }
 0x34c   : > { %v1765_v15 = vpop.eup %1764  ;;  %v1216_v43 = vadd.f32 %v1191_v56, %v1190_v50 }
 0x34d   : > { %v1176_v32 = vmul.f32 %v1765_v15, %v2435_v9  ;;  %v1177_v34 = vmul.f32 %v1765_v15, %v2439_v23  ;;  %v1161_v31 = vadd.f32 %v1160_v38, %v1159_v47  ;;  %v1203_v9 = vrot.slane %v1202_v41, 4 }
 0x34e   : > { %v1211_v61 = vadd.f32 %v1210_v51, %v1209_v37 }
 0x34f   : > { %v1192_v0 = vmul.f32 %v1176_v32, %v753_v53  ;;  %v1193_v28 = vmul.f32 %v1177_v34, %v754_v57  ;;  %1772 = vrcp.f32 %v1161_v31  ;;  %v1217_v53 = vrot.slane %v1216_v43, 4 }
 0x350   : > { %v1767_v35 = vpop.eup %1766 }
 0x351   : > { %v1223_v45 = vadd.f32 %v1193_v28, %v1192_v0  ;;  %v1178_v49 = vmul.f32 %v1767_v35, %v2443_v24  ;;  %v1179_v52 = vmul.f32 %v1767_v35, %v2445_v40  ;;  %v1204_v24 = vadd.f32 %v1203_v9, %v1202_v41 }
 0x352   : > { %v1218_v62 = vadd.f32 %v1217_v53, %v1216_v43 }
 0x353   : > { %v1769_v23 = vpop.eup %1768  ;;  %v1194_v27 = vmul.f32 %v1178_v49, %v755_v58  ;;  %v1195_v46 = vmul.f32 %v1179_v52, %v756_v3  ;;  %v1224_v18 = vrot.slane %v1223_v45, 4 }
 0x354   : > { %v1180_v57 = vmul.f32 %v1769_v23, %v2449_v12  ;;  %v1181_v20 = vmul.f32 %v1769_v23, %v2451_v5  ;;  %v1205_v5 = vrot.slane %v1204_v24, 2  ;;  %v1219_v42 = vrot.slane %v1218_v62, 2 }
 0x355   : > { %v1230_v22 = vadd.f32 %v1195_v46, %v1194_v27  ;;  %v1225_v33 = vadd.f32 %v1224_v18, %v1223_v45 }
 0x356   : > { %v1196_v40 = vmul.f32 %v1180_v57, %v757_v4  ;;  %v1197_v14 = vmul.f32 %v1181_v20, %v758_v2  ;;  %v2585_v4 = vmax.f32 %v2334_v6, 0.0  ;;  %v1212_v2 = vrot.slane %v1211_v61, 2 }
 0x357   : > { %v1231_v55 = vrot.slane %v1230_v22, 4  ;;  %v1771_v58 = vpop.eup %1770  ;;  %v1226_v39 = vrot.slane %v1225_v33, 2  ;;  %v1206_v17 = vadd.f32 %v1205_v5, %v1204_v24  ;;  %v1220_v10 = vadd.f32 %v1219_v42, %v1218_v62 }
 0x358   : > { %v1237_v3 = vadd.f32 %v1197_v14, %v1196_v40  ;;  %v1182_v25 = vmul.f32 %v1771_v58, %v2455_v19  ;;  %v1183_v12 = vmul.f32 %v1771_v58, %v2457_v29  ;;  %v1213_v15 = vadd.f32 %v1212_v2, %v1211_v61 }
 0x359   : > { %v1232_v30 = vadd.f32 %v1231_v55, %v1230_v22  ;;  %v1227_v50 = vadd.f32 %v1226_v39, %v1225_v33  ;;  %v1207_v34 = vrot.slane %v1206_v17, 1  ;;  %v1221_v0 = vrot.slane %v1220_v10, 1 }
 0x35a   : > { %v1238_v36 = vrot.slane %v1237_v3, 4  ;;  %v1199_v59 = vmul.f32 %v1183_v12, %v760_v16  ;;  %v1198_v1 = vmul.f32 %v1182_v25, %v2585_v4  ;;  %v2586_v16 = vmax.f32 %v2350_v11, 0.0 }
 0x35b   : > { %v1233_v54 = vrot.slane %v1232_v30, 2  ;;  %v1228_v28 = vrot.slane %v1227_v50, 1  ;;  %v1208_v11 = vadd.f32 %v1207_v34, %v1206_v17  ;;  %v1222_v49 = vadd.f32 %v1221_v0, %v1220_v10 }
 0x35c   : > { %v1239_v26 = vadd.f32 %v1238_v36, %v1237_v3  ;;  %v1244_v21 = vadd.f32 %v1199_v59, %v1198_v1  ;;  %v1773_v63 = vpop.eup %1772 }
 0x35d   : > { %v1184_v19 = vmul.f32 %v1773_v63, %v2461_v60  ;;  %v1185_v29 = vmul.f32 %v1773_v63, %v2463_v44  ;;  %v1234_v32 = vadd.f32 %v1233_v54, %v1232_v30  ;;  %v1214_v44 = vrot.slane %v1213_v15, 1 }
 0x35e   : > { %v1240_v7 = vrot.slane %v1239_v26, 2  ;;  %v1245_v47 = vrot.slane %v1244_v21, 4  ;;  %v1229_v9 = vadd.f32 %v1228_v28, %v1227_v50 }
 0x35f   : > { %v1201_v6 = vmul.f32 %v1185_v29, %v2586_v16  ;;  %v1200_v48 = vmul.f32 %v1184_v19, %v2587_v13  ;;  %v1235_v37 = vrot.slane %v1234_v32, 1  ;;  %v1215_v52 = vadd.f32 %v1214_v44, %v1213_v15 }
 0x360   : > { %v1246_v56 = vadd.f32 %v1245_v47, %v1244_v21  ;;  %v1241_v38 = vadd.f32 %v1240_v7, %v1239_v26 }
 0x361   : > { %v1251_v60 = vadd.f32 %v1201_v6, %v1200_v48  ;;  %v1236_v27 = vadd.f32 %v1235_v37, %v1234_v32  ;;  %v1267_v53 = vsel %vm1266_vm5, %v1215_v52, %v1208_v11 }
 0x362   : > { %v1247_v41 = vrot.slane %v1246_v56, 2  ;;  %v1242_v43 = vrot.slane %v1241_v38, 1  ;;  %v1269_v20 = vsel %vm1268_vm6, %v1222_v49, %v1267_v53 }
 0x363   : > { %v1252_v35 = vrot.slane %v1251_v60, 4  ;;  %v1271_v22 = vsel %vm1270_vm7, %v1229_v9, %v1269_v20 }
 0x364   : > { %v1248_v31 = vadd.f32 %v1247_v41, %v1246_v56  ;;  %v1243_v46 = vadd.f32 %v1242_v43, %v1241_v38  ;;  %v1273_v24 = vsel %vm1272_vm8, %v1236_v27, %v1271_v22 }
 0x365   : > { %v1253_v45 = vadd.f32 %v1252_v35, %v1251_v60 }
 0x366   : > { %v1249_v8 = vrot.slane %v1248_v31, 1  ;;  %v1275_v14 = vsel %vm1274_vm9, %v1243_v46, %v1273_v24 }
 0x367   : > { %v1254_v23 = vrot.slane %v1253_v45, 2 }
 0x368   : > { %v1250_v57 = vadd.f32 %v1249_v8, %v1248_v31 }
 0x369   : > { %v1255_v51 = vadd.f32 %v1254_v23, %v1253_v45 }
 0x36a   : > { %v1277_v55 = vsel %vm1276_vm10, %v1250_v57, %v1275_v14 }
 0x36b   : > { %v1256_v18 = vrot.slane %v1255_v51, 1 }
 0x36d   : > { %v1257_v40 = vadd.f32 %v1256_v18, %v1255_v51 }
 0x36f   : > { %v1279_v58 = vsel %vm1278_vm11, %v1257_v40, %v1277_v55 }
 0x370   : > { %1281 = vst [vmem:[%s299_s7] sm:$0xff] %v1279_v58 }
 0x371   : > { %1867 = shalt.err (!%p1864_p3)
}
 0x372   : > { %s1868_s30 = scalar_lea.hbm %s2520_s27, 128  ;;  %s1872_s19 = scalar_lea.hbm %s2563_s6, 256 }
 0x373   : > { %p1869_p2 = scmp.ne.s32.totalorder %s2520_s27, %s1868_s30  ;;  %p1873_p4 = scmp.lt.s32.totalorder %s2520_s27, %s2563_s6 }
 0x374   : > { %p1874_p6 = scmp.lt.s32.totalorder %s1872_s19, %s1868_s30 }
 0x375   : > { %p1870_p9 = pnand %p1869_p2, %p2588_p11 }
 0x376   : > { %p1875_p8 = por %p1874_p6, %p1873_p4 }
 0x377   : > { %p1871_p1 = pneg %p1870_p9 }
 0x379   : > { %p1876_p10 = pnand %p1875_p8, %p1871_p1 }
 0x37b   : > { %1879 = shalt.err (!%p1876_p10)
}
 0x37c   : > { %1609 = dma.vmem_to_hbm [thread:$0]  (%p2588_p11), %s1297_s10, 128, %s2520_s27, %s1283_s29  }
 0x37d PF: > { %s1308_s7 = sand.u32 1, %s1910_s21   ;;  %p2589_p7 = scmp.ne.s32.totalorder %s2574_s28, 0 }
 0x37e   : > { %p2590_p12 = scmp.ge.s32.totalorder %s1922_s24, 2  ;;  %s1309_s17 = scalar_lea.sflag [#allocation4], %s1308_s7 }
 0x380   : > { %p1623_p13 = pnand %p2590_p12, %p2589_p7 }
 0x382   : > { %p1624_p0 = pneg %p1623_p13 }
 0x384   : > { %1905 = dma.done.wait (%p1624_p0), %s1309_s17, 128  }
 0x385   : > { %1907 = vsyncadd (%p1624_p0), %s1309_s17, 4294967168  ;;  %p20_p5 = scmp.ge.s32.totalorder %s2044_s26, 4   ;;  %s2591_s21 = smov %s1914_s22 }
 0x386   : > { %s2592_s22 = smov %s1918_s23  ;;  %s2593_s23 = smov %s2053_s9 }
 0x387   : > { %s2594_s24 = smov %s2044_s26  ;;  %22 = sbr.rel (!%p20_p5) target bundleno = 6 (0x6), region = 97 }
 0x38c   :  { %1314 = vsyncpa [#allocation3], 1 }
 0x38d   :  { %1316 = vsyncpa [#allocation3 + $0x1], 1 }
 0x38e   :  { %1317 = vsyncpa [#allocation6], 1 }
 0x38f   :  { %1318 = vsyncpa [#allocation4], 1 }
 0x390   :  { %1320 = vsyncpa [#allocation4 + $0x1], 1 }

</bundles_post_ra>
